<compile_context>
chip_gen: v6e
topology: v6e:2x2x1
jax: 0.10.0
libtpu: 0.0.40
codegen_flags: <defaults>
</compile_context>

<pallas_src>
import numpy as np
import jax
import jax.numpy as jnp
from jax.experimental import pallas as pl
from jax.experimental.pallas import tpu as pltpu


# ----------------------------------------------------------------------------
# Mask construction (plain numpy glue — mirrors get_vingette_mask).
# ----------------------------------------------------------------------------
def get_vingette_mask(shape, offset=0, shape_type="circ"):
    assert len(shape) == 3
    c, h, w = shape
    if shape_type == "circ":
        assert h == w
        # TODO(synk): PIL ImageDraw.ellipse rasterization can differ by ±1 px on
        # the boundary; we use the analytic inscribed-ellipse fill instead.
        # Ellipse bounding box: (offset, offset) .. (h - offset, h - offset).
        cy = cx = h / 2.0
        r = (h - 2.0 * offset) / 2.0
        yy, xx = np.meshgrid(np.arange(h, dtype=np.float32),
                             np.arange(w, dtype=np.float32), indexing="ij")
        mask = (((xx - cx) ** 2 + (yy - cy) ** 2) <= r ** 2).astype(np.float32)
        mask = np.tile(np.expand_dims(mask, axis=0), (c, 1, 1))
        return mask
    elif shape_type == "rect":
        offset = int(offset)
        mask = np.ones(shape, dtype=np.float32)
        if offset > 0:  # guard: offset == 0 means "no border" (original [-0:] would zero all)
            mask[:, :offset, :] = 0
            mask[:, -offset:, :] = 0
            mask[:, :, -offset:] = 0
            mask[:, :, :offset] = 0
        return mask
    else:
        raise ValueError(shape_type)


# ----------------------------------------------------------------------------
# Pallas kernel: (R, L) tile of x times a (1, L) mask row (broadcast over rows).
# ----------------------------------------------------------------------------
def _vingette_kernel(v_ref, x_ref, o_ref):
    # Pure VPU work; the kernel is HBM-bandwidth bound.
    o_ref[...] = x_ref[...] * v_ref[...]


# Tile pickers: largest candidate that evenly divides the dim, else the full
# dim (a full-extent block always satisfies the (8, 128) constraint).
_LANE_TILE_CANDIDATES = (2048, 1024, 512, 384, 256, 128)   # all multiples of 128
_ROW_TILE_CANDIDATES = (256, 128, 64, 32, 16, 8)           # all multiples of 8


def _pick_tile(dim, candidates):
    for t in candidates:
        if t <= dim and dim % t == 0:
            return t
    return dim


_PALLAS_MIN_ELEMS = 256 * 1024  # below this, fused XLA elementwise is faster


def vingette_forward(v_flat, x, *, force_pallas=False):
    """v_flat: (1, H*W) mask; x: (N, C, H, W). Returns V * x in NCHW layout."""
    n, c, h, w = x.shape
    s = h * w
    rows = n * c
    assert v_flat.shape == (1, s)

    if v_flat.dtype != x.dtype:
        v_flat = v_flat.astype(x.dtype)

    # Tiny-input fallback: pallas_call / per-step overhead dominates at KB sizes.
    if not force_pallas and x.size < _PALLAS_MIN_ELEMS:
        return v_flat.reshape(1, 1, h, w) * x

    x2 = x.reshape(rows, s)  # lane-dense trailing axis (H*W)

    lane_tile = _pick_tile(s, _LANE_TILE_CANDIDATES)
    row_tile = _pick_tile(rows, _ROW_TILE_CANDIDATES)
    # Lane-tile axis OUTER so the mask block index is constant across the inner
    # (row) steps -> the tiny V tile is not re-fetched every grid step.
    grid = (s // lane_tile, rows // row_tile)

    out2 = pl.pallas_call(
        _vingette_kernel,
        out_shape=jax.ShapeDtypeStruct((rows, s), x.dtype),
        grid_spec=pltpu.PrefetchScalarGridSpec(
            num_scalar_prefetch=0,
            grid=grid,
            in_specs=[
                # Mask row: depends only on the lane-tile index.
                pl.BlockSpec((1, lane_tile), lambda si, ri: (0, si)),
                # Input tile.
                pl.BlockSpec((row_tile, lane_tile), lambda si, ri: (ri, si)),
            ],
            out_specs=pl.BlockSpec((row_tile, lane_tile), lambda si, ri: (ri, si)),
        ),
        compiler_params=pltpu.CompilerParams(
            dimension_semantics=("parallel", "parallel"),
            # Tiles need ~<=10 MiB double-buffered; raise the scoped limit with
            # headroom while staying under v7x's 64 MiB physical VMEM.
            vmem_limit_bytes=48 * 1024 * 1024,
        ),
    )(v_flat, x2)

    return out2.reshape(n, c, h, w)


class VingetteModule:
    """JAX/Pallas port of the PyTorch VingetteModule (y = V * x)."""

    def __init__(self, size, shape, offset, dtype=jnp.float32):
        c, h, w = size
        V = get_vingette_mask(size, shape_type=shape, offset=offset)
        # Full-shape mask kept for reference / parity with the PyTorch parameter.
        self.V = jnp.asarray(V, dtype=dtype)[None]  # (1, C, H, W)
        # Mask is identical across channels for both 'circ' and 'rect'; carry a
        # single flat row for the kernel (factor-C smaller HBM/VMEM footprint).
        # Stored once in the module dtype so no per-call re-cast is needed.
        self.V_flat = jnp.asarray(V[0].reshape(1, h * w), dtype=dtype)  # (1, H*W)

    def __call__(self, x, *, force_pallas=False):
        return vingette_forward(self.V_flat, x, force_pallas=force_pallas)


if __name__ == "__main__":
    N, C, H, W = 2, 4, 16, 16
    key = jax.random.PRNGKey(0)
    x = jax.random.normal(key, (N, C, H, W), dtype=jnp.float32)

    module = VingetteModule(size=(C, H, W), shape="circ", offset=0)
    # Force the Pallas path so the kernel itself is exercised even at this
    # tiny test size (production calls would take the fused-XLA fallback).
    out = module(x, force_pallas=True)
    out = jax.block_until_ready(out)

    # Reference check against plain-JAX broadcasted multiply with the full mask.
    ref = module.V * x
    assert out.shape == (N, C, H, W)
    np.testing.assert_allclose(np.asarray(out), np.asarray(ref), rtol=0, atol=0)

    print("KERNEL_OK")
</pallas_src>

<mosaic_0001>
module attributes {stable_mosaic.version = 11 : i64} {
  func.func @_vingette_kernel(%arg0: i32, %arg1: i32, %arg2: memref<1x256xf32, #tpu.memory_space<vmem>>, %arg3: memref<8x256xf32, #tpu.memory_space<vmem>>, %arg4: memref<8x256xf32, #tpu.memory_space<vmem>>) attributes {dimension_semantics = [#tpu.dimension_semantics<parallel>, #tpu.dimension_semantics<parallel>], iteration_bounds = array<i64: 1, 1>, scalar_prefetch = 0 : i64, scratch_operands = 0 : i64, tpu.core_type = #tpu.core_type<tc>, window_params = [{transform_indices = @transform_0, window_bounds = array<i64: 1, 256>}, {transform_indices = @transform_1, window_bounds = array<i64: 8, 256>}, {transform_indices = @transform_2, window_bounds = array<i64: 8, 256>}]} {
    %c0 = arith.constant 0 : index
    %c0_0 = arith.constant 0 : index
    %0 = vector.load %arg3[%c0, %c0_0] : memref<8x256xf32, #tpu.memory_space<vmem>>, vector<8x256xf32>
    %c0_1 = arith.constant 0 : index
    %c0_2 = arith.constant 0 : index
    %1 = vector.load %arg2[%c0_1, %c0_2] : memref<1x256xf32, #tpu.memory_space<vmem>>, vector<1x256xf32>
    %2 = vector.broadcast %1 : vector<1x256xf32> to vector<8x256xf32>
    %3 = arith.mulf %0, %2 : vector<8x256xf32>
    %c0_3 = arith.constant 0 : index
    %c0_4 = arith.constant 0 : index
    %4 = vector.load %arg4[%c0_3, %c0_4] : memref<8x256xf32, #tpu.memory_space<vmem>>, vector<8x256xf32>
    tpu.vector_store %arg4[%c0_3, %c0_4], %3 {strides = array<i32>} : memref<8x256xf32, #tpu.memory_space<vmem>>, vector<8x256xf32>,
    return
  }
  func.func @transform_0(%arg0: i32, %arg1: i32) -> (i32, i32) {
    %c0_i32 = arith.constant 0 : i32
    %c0_i32_0 = arith.constant 0 : i32
    return %c0_i32, %arg0 : i32, i32
  }
  func.func @transform_1(%arg0: i32, %arg1: i32) -> (i32, i32) {
    %c0_i32 = arith.constant 0 : i32
    return %arg1, %arg0 : i32, i32
  }
  func.func @transform_2(%arg0: i32, %arg1: i32) -> (i32, i32) {
    %c0_i32 = arith.constant 0 : i32
    return %arg1, %arg0 : i32, i32
  }
}

</mosaic_0001>

<bundles_post_ra>
// kernel: tpu_custom_call.1
= control target key start
LH: loop header
LB: loop body
LE: loop exit
PB: predicated region body
PF: predicated region fallthrough
CT: control target
= control target key end

     0   :  { %7 = vsyncpa [#allocation3], 0  ;;  %s166_s0 = inlined_call_operand.hbm [shape: f32[1,256], index: 0, kind: input, shape index: {}]   ;;  %s167_s1 = inlined_call_operand.hbm [shape: f32[8,256], index: 1, kind: input, shape index: {}]   ;;  %s168_s2 = inlined_call_operand.hbm [shape: f32[8,256], index: 2, kind: output, shape index: {}]  }
   0x1   :  { %8 = vsyncpa [#allocation6], 0 }
   0x2   :  { %9 = vsyncpa [#allocation4], 0  ;;  %s139_s9 = smov [#allocation2]   ;;  %s140_s11 = smov [#allocation5]  }
   0x3   :  { %s16_s10 = sshll.u32 %s139_s9, 4  ;;  %s26_s12 = sshll.u32 %s140_s11, 4  ;;  %s17_s10 = int_to_ptr.vmem [resolvable:$true] %s16_s10  ;;  %s27_s12 = int_to_ptr.vmem [resolvable:$true] %s26_s12 }
   0x4   :  { %s81_s13 = scalar_lea.vmem %s17_s10, 32  ;;  %p86_p1 = scmp.lt.s32.totalorder %s17_s10, %s17_s10 }
   0x5   :  { %p82_p0 = scmp.ne.s32.totalorder %s17_s10, %s81_s13  ;;  %p87_p2 = scmp.lt.s32.totalorder %s81_s13, %s81_s13 }
   0x7   :  { %p88_p3 = por %p87_p2, %p86_p1 }
   0x9   :  { %p89_p4 = pnand %p88_p3, %p82_p0 }
   0xb   :  { %92 = shalt.err (!%p89_p4)
}
   0xc   :  { %19 = dma.hbm_to_vmem [thread:$0]  %s166_s0, 32, %s17_s10, [#allocation3]  }
   0xd   :  { %s101_s16 = scalar_lea.vmem %s27_s12, 256  ;;  %p106_p6 = scmp.lt.s32.totalorder %s27_s12, %s27_s12 }
   0xe   :  { %p102_p5 = scmp.ne.s32.totalorder %s27_s12, %s101_s16  ;;  %p107_p7 = scmp.lt.s32.totalorder %s101_s16, %s101_s16 }
  0x10   :  { %p108_p8 = por %p107_p7, %p106_p6 }
  0x12   :  { %p109_p9 = pnand %p108_p8, %p102_p5 }
  0x14   :  { %112 = shalt.err (!%p109_p9)
}
  0x15   :  { %29 = dma.hbm_to_vmem [thread:$0]  %s167_s1, 256, %s27_s12, [#allocation6]  }
  0x16   :  { %133 = dma.done.wait [#allocation3], 32  }
  0x17   :  { %134 = vsyncadd [#allocation3], 4294967264 }
  0x18   :  { %135 = dma.done.wait [#allocation6], 256  }
  0x19   :  { %136 = vsyncadd [#allocation6], 4294967040  ;;  %v40_v0 = vlaneseq  ;;  %v36_v4 = vld [vmem:[#allocation5] sm:$0xff]  ;;  %v38_v5 = vld [vmem:[#allocation2] sm:$0x3]  ;;  %s141_s0 = smov [#allocation7]  }
  0x1a   :  { %v37_v6 = vld [vmem:[#allocation5 + $0x8] sm:$0xff]  ;;  %s60_s19 = sshll.u32 %s141_s0, 4  ;;  %s61_s19 = int_to_ptr.vmem [resolvable:$true] %s60_s19 }
  0x1b   :  { %v41_v1 = vshrl.u32 %v40_v0, 7  ;;  %s113_s1 = scalar_lea.vmem %s61_s19, 256  ;;  %p118_p11 = scmp.lt.s32.totalorder %s61_s19, %s61_s19 }
  0x1c   :  { %p114_p10 = scmp.ne.s32.totalorder %s61_s19, %s113_s1  ;;  %p119_p12 = scmp.lt.s32.totalorder %s113_s1, %s113_s1 }
  0x1d   :  { %v42_v2 = vsub.s32 0, %v41_v1  ;;  %v46_v3 = vsub.s32 1, %v41_v1 }
  0x1e   :  { %p120_p13 = por %p119_p12, %p118_p11 }
  0x1f   :  { %v43_v7 = vrot.slane %v38_v5, %v42_v2  ;;  %v47_v8 = vrot.slane %v38_v5, %v46_v3 }
  0x20   :  { %p121_p0 = pnand %p120_p13, %p114_p10 }
  0x21   :  { %v50_v9 = vmul.f32 %v43_v7, %v36_v4  ;;  %v51_v10 = vmul.f32 %v47_v8, %v37_v6 }
  0x23   :  { %52 = vst [vmem:[#allocation7] sm:$0xff] %v50_v9  ;;  %53 = vst [vmem:[#allocation7 + $0x8] sm:$0xff] %v51_v10 }
  0x24   :  { %124 = shalt.err (!%p121_p0)
}
  0x25   :  { %63 = dma.vmem_to_hbm [thread:$0]  %s61_s19, 256, %s168_s2, [#allocation4]  }
  0x26   :  { %137 = dma.done.wait [#allocation4], 256  }
  0x27   :  { %138 = vsyncadd [#allocation4], 4294967040 }
  0x28   :  { %67 = vsyncpa [#allocation3], 1 }
  0x29   :  { %68 = vsyncpa [#allocation6], 1 }
  0x2a   :  { %69 = vsyncpa [#allocation4], 1 }

</bundles_post_ra>
